<compile_context>
chip_gen: v6e
topology: v6e:2x2x1
jax: 0.10.0
libtpu: 0.0.40
codegen_flags: <defaults>
</compile_context>

<pallas_src>
import functools

import jax
import jax.numpy as jnp
import numpy as np
from jax.experimental import pallas as pl
from jax.experimental.pallas import tpu as pltpu

LN_EPS = 1e-5
VMEM_LIMIT_BYTES = 48 * 1024 * 1024     # < v7x's 64 MiB physical VMEM


def _round_up(x, m):
    return (x + m - 1) // m * m


# ----------------------------------------------------------------------------
# Kernel A: edge-wise fused QKV projection + head-replicated per-edge scores
# ----------------------------------------------------------------------------
def _proj_scores_kernel(x_ref, wqkv_ref, bqkv_ref, pool_ref, v_ref, s_ref,
                        *, d, scale):
    qkv = jnp.dot(x_ref[...], wqkv_ref[...],
                  preferred_element_type=jnp.float32) + bqkv_ref[...]
    q = qkv[:, 0 * d:1 * d]
    k = qkv[:, 1 * d:2 * d]
    v = qkv[:, 2 * d:3 * d]
    v_ref[...] = v.astype(v_ref.dtype)

    # s[e, c] = scale * <Q[e, head(c)], K[e, head(c)]>, head-replicated over the
    # head's lanes via a static block-diagonal pooling matmul (built in wrapper).
    qk = (q * k).astype(jnp.bfloat16)
    s_ref[...] = scale * jnp.dot(qk, pool_ref[...],
                                 preferred_element_type=jnp.float32)


# ----------------------------------------------------------------------------
# Kernel B: materialize softmax numerator terms once: w = exp(s - gmax), w * V
# ----------------------------------------------------------------------------
def _exp_weights_kernel(s_ref, v_ref, gmax_ref, w_ref, wv_ref):
    w = jnp.exp(s_ref[...] - gmax_ref[...])                     # f32
    w_ref[...] = w.astype(w_ref.dtype)                          # bf16
    wv_ref[...] = (w * v_ref[...].astype(jnp.float32)).astype(wv_ref.dtype)


# ----------------------------------------------------------------------------
# Kernel C: node-wise softmax aggregation (scatter_softmax + scatter_sum)
#           pure bf16 matmuls with resident f32 accumulators
# ----------------------------------------------------------------------------
def _node_aggregate_kernel(inc_ref, w_ref, wv_ref, msg_ref, num_acc, den_acc):
    k = pl.program_id(1)

    @pl.when(k == 0)
    def _zero():
        num_acc[...] = jnp.zeros_like(num_acc)
        den_acc[...] = jnp.zeros_like(den_acc)

    inc = inc_ref[...]                                           # [TN, TE] bf16
    num_acc[...] += jnp.dot(inc, wv_ref[...],
                            preferred_element_type=jnp.float32)
    den_acc[...] += jnp.dot(inc, w_ref[...],
                            preferred_element_type=jnp.float32)

    @pl.when(k == pl.num_programs(1) - 1)
    def _finalize():
        # guard isolated / padded nodes (den == 0); EUP approximate reciprocal
        inv = pl.reciprocal(jnp.maximum(den_acc[...], 1e-20), approx=True)
        msg_ref[...] = (num_acc[...] * inv).astype(msg_ref.dtype)


# ----------------------------------------------------------------------------
# Kernel D: gather node messages back to edges + out_proj + residual + LayerNorm
# ----------------------------------------------------------------------------
def _edge_output_kernel(inc_ref, msg_ref, x_ref, wo_ref, bo_ref,
                        gamma_ref, beta_ref, y_ref, acc, *, eps):
    k = pl.program_id(1)

    @pl.when(k == 0)
    def _zero():
        acc[...] = jnp.zeros_like(acc)

    # inc tile is [TN, TE]; contract over the node axis of BOTH operands
    # (== inc^T @ msg) so no transposed incidence copy is ever materialized.
    acc[...] += jax.lax.dot_general(
        inc_ref[...], msg_ref[...],
        dimension_numbers=(((0,), (0,)), ((), ())),
        preferred_element_type=jnp.float32)

    @pl.when(k == pl.num_programs(1) - 1)
    def _finalize():
        edge_msg = (acc[...] * 0.5).astype(jnp.bfloat16)   # (msg[src]+msg[dst])/2
        out = jnp.dot(edge_msg, wo_ref[...],
                      preferred_element_type=jnp.float32) + bo_ref[...]
        y = out + x_ref[...]                               # residual (f32 input)
        mean = jnp.mean(y, axis=-1, keepdims=True)         # two-pass LayerNorm
        yc = y - mean
        var = jnp.mean(yc * yc, axis=-1, keepdims=True)
        y_ref[...] = yc * jax.lax.rsqrt(var + eps) * gamma_ref[...] + beta_ref[...]


# ----------------------------------------------------------------------------
# Wrapper
# ----------------------------------------------------------------------------
def edge_attention_layer_fast(edge_features, edge_index, num_nodes, params, *,
                              heads):
    E, d = edge_features.shape
    assert d % heads == 0, "in_channels must be divisible by heads"
    assert d % 128 == 0, "in_channels must be a multiple of 128 (lane-dense layout)"
    d_head = d // heads
    scale = float(d_head) ** -0.5

    # Tiles: contraction dims (tile_e in kernel C, tile_n in kernel D) are
    # 256-multiples to fill the 2x256^2 MXU on v6e/v7x; edge tiles grow to 512
    # for large E to amortize per-grid-step overhead.
    tile_e = 256 if E <= 256 else 512
    E_p = _round_up(E, tile_e)
    tile_n = min(_round_up(max(num_nodes, 1), 256), 2048)
    N_p = _round_up(num_nodes, tile_n)
    n_e = E_p // tile_e
    n_n = N_p // tile_n

    x = jnp.zeros((E_p, d), jnp.float32).at[:E, :].set(
        edge_features.astype(jnp.float32))
    x_bf = x.astype(jnp.bfloat16)

    # Single incidence matrix inc[n, e] in {0,1,2} (exact in bf16). Self-loops
    # count twice, matching torch's node2edge concat. No transposed copy.
    src = edge_index[0].astype(jnp.int32)
    dst = edge_index[1].astype(jnp.int32)
    eidx = jnp.arange(E, dtype=jnp.int32)
    inc = jnp.zeros((N_p, E_p), jnp.float32)
    inc = inc.at[src, eidx].add(1.0).at[dst, eidx].add(1.0)
    inc_bf = inc.astype(jnp.bfloat16)

    # Fused QKV weights: one wide bf16 MXU matmul with f32 accumulation.
    wqkv_bf = jnp.concatenate([params["wq"], params["wk"], params["wv"]],
                              axis=1).astype(jnp.bfloat16)
    bqkv = jnp.concatenate([params["bq"], params["bk"], params["bv"]], axis=1)
    wo_bf = params["wo"].astype(jnp.bfloat16)

    # Static block-diagonal head-pooling matrix (hoisted out of the kernel).
    pool_bf = jnp.asarray(
        np.kron(np.eye(heads, dtype=np.float32),
                np.ones((d_head, d_head), np.float32)),
        dtype=jnp.bfloat16)

    # ---- Kernel A: projections + scores (fully parallel over edge tiles) ----
    v_bf, s_full = pl.pallas_call(
        functools.partial(_proj_scores_kernel, d=d, scale=scale),
        out_shape=(jax.ShapeDtypeStruct((E_p, d), jnp.bfloat16),
                   jax.ShapeDtypeStruct((E_p, d), jnp.float32)),
        grid=(n_e,),
        in_specs=[pl.BlockSpec((tile_e, d), lambda i: (i, 0)),
                  pl.BlockSpec((d, 3 * d), lambda i: (0, 0)),
                  pl.BlockSpec((1, 3 * d), lambda i: (0, 0)),
                  pl.BlockSpec((d, d), lambda i: (0, 0))],
        out_specs=(pl.BlockSpec((tile_e, d), lambda i: (i, 0)),
                   pl.BlockSpec((tile_e, d), lambda i: (i, 0))),
        compiler_params=pltpu.CompilerParams(
            dimension_semantics=("parallel",),
            vmem_limit_bytes=VMEM_LIMIT_BYTES),
    )(x_bf, wqkv_bf, bqkv, pool_bf)

    # Global per-head score max (tiny XLA reduction). The shift cancels in
    # num/den, so this matches scatter_softmax up to rounding / extreme tails.
    gmax = jnp.max(s_full, axis=0, keepdims=True)

    # ---- Kernel B: w = exp(s - gmax), wv = w * V, once, in bf16 ----
    w_bf, wv_bf = pl.pallas_call(
        _exp_weights_kernel,
        out_shape=(jax.ShapeDtypeStruct((E_p, d), jnp.bfloat16),
                   jax.ShapeDtypeStruct((E_p, d), jnp.bfloat16)),
        grid=(n_e,),
        in_specs=[pl.BlockSpec((tile_e, d), lambda i: (i, 0)),
                  pl.BlockSpec((tile_e, d), lambda i: (i, 0)),
                  pl.BlockSpec((1, d), lambda i: (0, 0))],
        out_specs=(pl.BlockSpec((tile_e, d), lambda i: (i, 0)),
                   pl.BlockSpec((tile_e, d), lambda i: (i, 0))),
        compiler_params=pltpu.CompilerParams(
            dimension_semantics=("parallel",),
            vmem_limit_bytes=VMEM_LIMIT_BYTES),
    )(s_full, v_bf, gmax)

    # ---- Kernel C: per-node softmax aggregation (pure bf16 matmuls) ----
    msg_node = pl.pallas_call(
        _node_aggregate_kernel,
        out_shape=jax.ShapeDtypeStruct((N_p, d), jnp.bfloat16),
        grid=(n_n, n_e),                        # node tiles parallel, edges reduce
        in_specs=[pl.BlockSpec((tile_n, tile_e), lambda i, k: (i, k)),
                  pl.BlockSpec((tile_e, d), lambda i, k: (k, 0)),
                  pl.BlockSpec((tile_e, d), lambda i, k: (k, 0))],
        out_specs=pl.BlockSpec((tile_n, d), lambda i, k: (i, 0)),
        scratch_shapes=[pltpu.VMEM((tile_n, d), jnp.float32),
                        pltpu.VMEM((tile_n, d), jnp.float32)],
        compiler_params=pltpu.CompilerParams(
            dimension_semantics=("parallel", "arbitrary"),
            vmem_limit_bytes=VMEM_LIMIT_BYTES),
    )(inc_bf, w_bf, wv_bf)

    # ---- Kernel D: gather to edges + out_proj + residual + LayerNorm ----
    y = pl.pallas_call(
        functools.partial(_edge_output_kernel, eps=LN_EPS),
        out_shape=jax.ShapeDtypeStruct((E_p, d), jnp.float32),
        grid=(n_e, n_n),                        # edge tiles parallel, nodes reduce
        in_specs=[pl.BlockSpec((tile_n, tile_e), lambda i, k: (k, i)),
                  pl.BlockSpec((tile_n, d), lambda i, k: (k, 0)),
                  pl.BlockSpec((tile_e, d), lambda i, k: (i, 0)),
                  pl.BlockSpec((d, d), lambda i, k: (0, 0)),
                  pl.BlockSpec((1, d), lambda i, k: (0, 0)),
                  pl.BlockSpec((1, d), lambda i, k: (0, 0)),
                  pl.BlockSpec((1, d), lambda i, k: (0, 0))],
        out_specs=pl.BlockSpec((tile_e, d), lambda i, k: (i, 0)),
        scratch_shapes=[pltpu.VMEM((tile_e, d), jnp.float32)],
        compiler_params=pltpu.CompilerParams(
            dimension_semantics=("parallel", "arbitrary"),
            vmem_limit_bytes=VMEM_LIMIT_BYTES),
    )(inc_bf, msg_node, x, wo_bf, params["bo"],
      params["gamma"], params["beta"])

    return y[:E, :]


# ----------------------------------------------------------------------------
# Parameters + pure-JAX reference (mirrors the torch forward, scatter ops)
# ----------------------------------------------------------------------------
def init_params(key, d):
    keys = jax.random.split(key, 8)
    bound = 1.0 / np.sqrt(d)
    u = lambda k, shape: jax.random.uniform(k, shape, jnp.float32, -bound, bound)
    return dict(
        wq=u(keys[0], (d, d)), bq=u(keys[1], (1, d)),
        wk=u(keys[2], (d, d)), bk=u(keys[3], (1, d)),
        wv=u(keys[4], (d, d)), bv=u(keys[5], (1, d)),
        wo=u(keys[6], (d, d)), bo=u(keys[7], (1, d)),
        gamma=jnp.ones((1, d), jnp.float32),
        beta=jnp.zeros((1, d), jnp.float32),
    )


def _reference_forward(x, edge_index, num_nodes, p, heads):
    E, d = x.shape
    D = d // heads
    scale = float(D) ** -0.5
    q = (x @ p["wq"] + p["bq"]).reshape(E, heads, D)
    k = (x @ p["wk"] + p["bk"]).reshape(E, heads, D)
    v = (x @ p["wv"] + p["bv"]).reshape(E, heads, D)
    node2edge = jnp.concatenate([edge_index[0], edge_index[1]]).astype(jnp.int32)
    edge2idx = jnp.concatenate([jnp.arange(E), jnp.arange(E)])
    qn, kn, vn = q[edge2idx], k[edge2idx], v[edge2idx]
    scores = (qn * kn).sum(-1) * scale                          # [2E, H]
    smax = jax.ops.segment_max(scores, node2edge, num_segments=num_nodes)
    w = jnp.exp(scores - smax[node2edge])
    den = jax.ops.segment_sum(w, node2edge, num_segments=num_nodes)
    attn = w / den[node2edge]                                   # scatter_softmax
    out = attn[..., None] * vn                                  # [2E, H, D]
    msg = jax.ops.segment_sum(out, node2edge, num_segments=num_nodes)
    em = (msg[edge_index[0]] + msg[edge_index[1]]) * 0.5
    em = em.reshape(E, d)
    o = em @ p["wo"] + p["bo"]
    y = o + x
    mu = y.mean(axis=-1, keepdims=True)
    var = ((y - mu) ** 2).mean(axis=-1, keepdims=True)
    return (y - mu) / jnp.sqrt(var + LN_EPS) * p["gamma"] + p["beta"]


# ----------------------------------------------------------------------------
if __name__ == "__main__":
    E = 200
    num_nodes = 50
    in_channels = 128
    heads = 4

    key = jax.random.PRNGKey(0)
    k_x, k_src, k_dst, k_p = jax.random.split(key, 4)

    edge_features = jax.random.normal(k_x, (E, in_channels), jnp.float32)
    src = jax.random.randint(k_src, (E,), 0, num_nodes, dtype=jnp.int32)
    dst = jax.random.randint(k_dst, (E,), 0, num_nodes, dtype=jnp.int32)
    edge_index = jnp.stack([src, dst])                  # [2, E] (self-loops possible)

    params = init_params(k_p, in_channels)

    out = edge_attention_layer_fast(edge_features, edge_index, num_nodes,
                                    params, heads=heads)
    out = jax.block_until_ready(out)
    assert out.shape == (E, in_channels), out.shape

    ref = jax.block_until_ready(
        _reference_forward(edge_features, edge_index, num_nodes, params, heads))
    np.testing.assert_allclose(np.asarray(out), np.asarray(ref),
                               rtol=2e-2, atol=2e-2)

    print("KERNEL_OK")
</pallas_src>

<mosaic_0001>
module attributes {stable_mosaic.version = 11 : i64} {
  func.func @_proj_scores_kernel(%arg0: i32, %arg1: memref<256x128xbf16, #tpu.memory_space<vmem>>, %arg2: memref<128x384xbf16, #tpu.memory_space<vmem>>, %arg3: memref<1x384xf32, #tpu.memory_space<vmem>>, %arg4: memref<128x128xbf16, #tpu.memory_space<vmem>>, %arg5: memref<256x128xbf16, #tpu.memory_space<vmem>>, %arg6: memref<256x128xf32, #tpu.memory_space<vmem>>) attributes {dimension_semantics = [#tpu.dimension_semantics<parallel>], iteration_bounds = array<i64: 1>, scalar_prefetch = 0 : i64, scratch_operands = 0 : i64, tpu.core_type = #tpu.core_type<tc>, window_params = [{transform_indices = @transform_0, window_bounds = array<i64: 256, 128>}, {pipeline_mode = #tpu.pipeline_mode<synchronous>, transform_indices = @transform_1, window_bounds = array<i64: 128, 384>}, {pipeline_mode = #tpu.pipeline_mode<synchronous>, transform_indices = @transform_2, window_bounds = array<i64: 1, 384>}, {pipeline_mode = #tpu.pipeline_mode<synchronous>, transform_indices = @transform_3, window_bounds = array<i64: 128, 128>}, {transform_indices = @transform_4, window_bounds = array<i64: 256, 128>}, {transform_indices = @transform_5, window_bounds = array<i64: 256, 128>}]} {
    %c0 = arith.constant 0 : index
    %c0_0 = arith.constant 0 : index
    %0 = vector.load %arg1[%c0, %c0_0] : memref<256x128xbf16, #tpu.memory_space<vmem>>, vector<256x128xbf16>
    %c0_1 = arith.constant 0 : index
    %c0_2 = arith.constant 0 : index
    %1 = vector.load %arg2[%c0_1, %c0_2] : memref<128x384xbf16, #tpu.memory_space<vmem>>, vector<128x384xbf16>
    %cst = arith.constant dense<0.000000e+00> : vector<256x384xf32>
    %2 = tpu.matmul %0, %1, %cst {dimension_numbers = #tpu.dot_dimension_numbers<[1], [0], [0], [1], [0, 0, 1, 1], [], []>} : vector<256x128xbf16>, vector<128x384xbf16>, vector<256x384xf32> -> vector<256x384xf32>
    %c0_3 = arith.constant 0 : index
    %c0_4 = arith.constant 0 : index
    %3 = vector.load %arg3[%c0_3, %c0_4] : memref<1x384xf32, #tpu.memory_space<vmem>>, vector<1x384xf32>
    %4 = vector.broadcast %3 : vector<1x384xf32> to vector<256x384xf32>
    %5 = arith.addf %2, %4 : vector<256x384xf32>
    %6 = vector.extract_strided_slice %5 {offsets = [0, 0], sizes = [256, 128], strides = [1, 1]} : vector<256x384xf32> to vector<256x128xf32>
    %7 = vector.extract_strided_slice %5 {offsets = [0, 128], sizes = [256, 128], strides = [1, 1]} : vector<256x384xf32> to vector<256x128xf32>
    %8 = vector.extract_strided_slice %5 {offsets = [0, 256], sizes = [256, 128], strides = [1, 1]} : vector<256x384xf32> to vector<256x128xf32>
    %9 = arith.truncf %8 : vector<256x128xf32> to vector<256x128xbf16>
    %c0_5 = arith.constant 0 : index
    %c0_6 = arith.constant 0 : index
    %10 = vector.load %arg5[%c0_5, %c0_6] : memref<256x128xbf16, #tpu.memory_space<vmem>>, vector<256x128xbf16>
    tpu.vector_store %arg5[%c0_5, %c0_6], %9 {strides = array<i32>} : memref<256x128xbf16, #tpu.memory_space<vmem>>, vector<256x128xbf16>,
    %11 = arith.mulf %6, %7 : vector<256x128xf32>
    %12 = arith.truncf %11 : vector<256x128xf32> to vector<256x128xbf16>
    %c0_7 = arith.constant 0 : index
    %c0_8 = arith.constant 0 : index
    %13 = vector.load %arg4[%c0_7, %c0_8] : memref<128x128xbf16, #tpu.memory_space<vmem>>, vector<128x128xbf16>
    %cst_9 = arith.constant dense<0.000000e+00> : vector<256x128xf32>
    %14 = tpu.matmul %12, %13, %cst_9 {dimension_numbers = #tpu.dot_dimension_numbers<[1], [0], [0], [1], [0, 0, 1, 1], [], []>} : vector<256x128xbf16>, vector<128x128xbf16>, vector<256x128xf32> -> vector<256x128xf32>
    %cst_10 = arith.constant 0.176776692 : f32
    %15 = vector.broadcast %cst_10 : f32 to vector<256x128xf32>
    %16 = arith.mulf %15, %14 : vector<256x128xf32>
    %c0_11 = arith.constant 0 : index
    %c0_12 = arith.constant 0 : index
    %17 = vector.load %arg6[%c0_11, %c0_12] : memref<256x128xf32, #tpu.memory_space<vmem>>, vector<256x128xf32>
    tpu.vector_store %arg6[%c0_11, %c0_12], %16 {strides = array<i32>} : memref<256x128xf32, #tpu.memory_space<vmem>>, vector<256x128xf32>,
    return
  }
  func.func @transform_0(%arg0: i32) -> (i32, i32) {
    %c0_i32 = arith.constant 0 : i32
    %c0_i32_0 = arith.constant 0 : i32
    return %arg0, %c0_i32 : i32, i32
  }
  func.func @transform_1(%arg0: i32) -> (i32, i32) {
    %c0_i32 = arith.constant 0 : i32
    %c0_i32_0 = arith.constant 0 : i32
    %c0_i32_1 = arith.constant 0 : i32
    return %c0_i32, %c0_i32_0 : i32, i32
  }
  func.func @transform_2(%arg0: i32) -> (i32, i32) {
    %c0_i32 = arith.constant 0 : i32
    %c0_i32_0 = arith.constant 0 : i32
    %c0_i32_1 = arith.constant 0 : i32
    return %c0_i32, %c0_i32_0 : i32, i32
  }
  func.func @transform_3(%arg0: i32) -> (i32, i32) {
    %c0_i32 = arith.constant 0 : i32
    %c0_i32_0 = arith.constant 0 : i32
    %c0_i32_1 = arith.constant 0 : i32
    return %c0_i32, %c0_i32_0 : i32, i32
  }
  func.func @transform_4(%arg0: i32) -> (i32, i32) {
    %c0_i32 = arith.constant 0 : i32
    %c0_i32_0 = arith.constant 0 : i32
    return %arg0, %c0_i32 : i32, i32
  }
  func.func @transform_5(%arg0: i32) -> (i32, i32) {
    %c0_i32 = arith.constant 0 : i32
    %c0_i32_0 = arith.constant 0 : i32
    return %arg0, %c0_i32 : i32, i32
  }
}

</mosaic_0001>

<bundles_post_ra>
// kernel: tpu_custom_call.1
= control target key start
LH: loop header
LB: loop body
LE: loop exit
PB: predicated region body
PF: predicated region fallthrough
CT: control target
= control target key end

     0   :  { %11 = vsyncpa [#allocation3], 0  ;;  %s1967_s0 = inlined_call_operand.hbm [shape: bf16[256,128], index: 0, kind: input, shape index: {}]   ;;  %s1968_s1 = inlined_call_operand.hbm [shape: bf16[128,384], index: 1, kind: input, shape index: {}]   ;;  %s1969_s2 = inlined_call_operand.vmem [shape: f32[1,384], index: 2, kind: input, shape index: {}]   ;;  %s1970_s3 = inlined_call_operand.hbm [shape: bf16[128,128], index: 3, kind: input, shape index: {}]   ;;  %s1971_s4 = inlined_call_operand.hbm [shape: bf16[256,128], index: 4, kind: output, shape index: {0}]   ;;  %s1972_s5 = inlined_call_operand.hbm [shape: f32[256,128], index: 5, kind: output, shape index: {1}]  }
   0x1   :  { %12 = vsyncpa [#allocation6], 0 }
   0x2   :  { %13 = vsyncpa [#allocation4], 0 }
   0x3   :  { %14 = vsyncpa [#allocation10], 0  ;;  %s1780_s18 = smov [#allocation5]  }
   0x4   :  { %s32_s19 = sshll.u32 %s1780_s18, 4  ;;  %s33_s19 = int_to_ptr.vmem [resolvable:$true] %s32_s19 }
   0x5   :  { %s1680_s20 = scalar_lea.vmem %s33_s19, 3072  ;;  %p1685_p1 = scmp.lt.s32.totalorder %s33_s19, %s33_s19 }
   0x6   :  { %p1681_p0 = scmp.ne.s32.totalorder %s33_s19, %s1680_s20  ;;  %p1686_p2 = scmp.lt.s32.totalorder %s1680_s20, %s1680_s20 }
   0x8   :  { %p1687_p3 = por %p1686_p2, %p1685_p1 }
   0xa   :  { %p1688_p4 = pnand %p1687_p3, %p1681_p0 }
   0xc   :  { %1691 = shalt.err (!%p1688_p4)
}
   0xd   :  { %s1781_s21 = smov 192   ;;  %s1782_s22 = smov 12  }
   0xe   :  { %38 = dma.hbm_to_vmem [thread:$0]  %s1968_s1, 3072, %s33_s19, [#allocation6], %s1781_s21, %s1781_s21, %s1782_s22  }
   0xf   :  { %s1783_s25 = smov [#allocation2]  }
  0x10   :  { %s20_s26 = sshll.u32 %s1783_s25, 4  ;;  %s21_s26 = int_to_ptr.vmem [resolvable:$true] %s20_s26 }
  0x11   :  { %s1700_s27 = scalar_lea.vmem %s21_s26, 2048  ;;  %p1705_p6 = scmp.lt.s32.totalorder %s21_s26, %s21_s26 }
  0x12   :  { %p1701_p5 = scmp.ne.s32.totalorder %s21_s26, %s1700_s27  ;;  %p1706_p7 = scmp.lt.s32.totalorder %s1700_s27, %s1700_s27 }
  0x14   :  { %p1707_p8 = por %p1706_p7, %p1705_p6 }
  0x16   :  { %p1708_p9 = pnand %p1707_p8, %p1701_p5 }
  0x18   :  { %1711 = shalt.err (!%p1708_p9)
}
  0x19   :  { %s1784_s28 = smov 64   ;;  %s1785_s29 = smov 4  }
  0x1a   :  { %26 = dma.hbm_to_vmem [thread:$0]  %s1967_s0, 2048, %s21_s26, [#allocation3], %s1784_s28, %s1784_s28, %s1785_s29  }
  0x1b   :  { %s1786_s1 = smov [#allocation7]  }
  0x1c   :  { %s46_s7 = sshll.u32 %s1786_s1, 4  ;;  %s47_s7 = int_to_ptr.vmem [resolvable:$true] %s46_s7 }
  0x1d   :  { %s1720_s8 = scalar_lea.vmem %s47_s7, 1024  ;;  %p1725_p11 = scmp.lt.s32.totalorder %s47_s7, %s47_s7 }
  0x1e   :  { %p1721_p10 = scmp.ne.s32.totalorder %s47_s7, %s1720_s8  ;;  %p1726_p12 = scmp.lt.s32.totalorder %s1720_s8, %s1720_s8 }
  0x20   :  { %p1727_p13 = por %p1726_p12, %p1725_p11 }
  0x22   :  { %p1728_p0 = pnand %p1727_p13, %p1721_p10 }
  0x24   :  { %1731 = shalt.err (!%p1728_p0)
}
  0x25   :  { %52 = dma.hbm_to_vmem [thread:$0]  %s1970_s3, 1024, %s47_s7, [#allocation6], %s1784_s28, %s1784_s28, %s1785_s29  }
  0x26   :  { %1772 = dma.done.wait [#allocation3], 2048  }
  0x27   :  { %1773 = vsyncadd [#allocation3], 4294965248 }
  0x28   :  { %1774 = dma.done.wait [#allocation6], 4096  }
  0x29   :  { %1775 = vsyncadd [#allocation6], 4294963200  ;;  %v1787_v0 = vmov 0   ;;  %v1616_v1 = vld [vmem:[#allocation5 + $0xac] ss:$12 sps:$4 sm:$0xff]   ;;  %v1640_v9 = vld [vmem:[#allocation2] sm:$0xff]   ;;  %v129_v49 = vlaneseq }
  0x2a   :  { %400 = vmatprep.mubr.bf16.mxu0 %v1787_v0  ;;  %v1618_v2 = vld [vmem:[#allocation5 + $0xa8] ss:$12 sps:$4 sm:$0xff]   ;;  %368 = vmatprep.subr.bf16.mxu0 %v1616_v1  ;;  %v1621_v4 = vld [vmem:[#allocation5 + $0x90] ss:$12 sps:$4 sm:$0xff]   ;;  %v1624_v6 = vld [vmem:[#allocation5 + $0x78] ss:$12 sps:$4 sm:$0xff]  }
  0x2b   :  { %v1619_v3 = vld [vmem:[#allocation5 + $0x94] ss:$12 sps:$4 sm:$0xff]   ;;  %369 = vmatpush1.bf16.msra.mxu0 %v1618_v2  ;;  %v1622_v5 = vld [vmem:[#allocation5 + $0x7c] ss:$12 sps:$4 sm:$0xff]   ;;  %v1625_v7 = vld [vmem:[#allocation5 + $0x64] ss:$12 sps:$4 sm:$0xff]   ;;  %1524 = vmatprep.mubr.bf16.mxu1 %v1640_v9 }
  0x2c   :  { %370 = vmatprep.subr.bf16.mxu0 %v1619_v3  ;;  %v1627_v8 = vld [vmem:[#allocation5 + $0x60] ss:$12 sps:$4 sm:$0xff]   ;;  %v1630_v11 = vld [vmem:[#allocation5 + $0x48] ss:$12 sps:$4 sm:$0xff]   ;;  %v1633_v13 = vld [vmem:[#allocation5 + $0x30] ss:$12 sps:$4 sm:$0xff]  }
  0x2d   :  { %v1628_v10 = vld [vmem:[#allocation5 + $0x4c] ss:$12 sps:$4 sm:$0xff]   ;;  %v1631_v12 = vld [vmem:[#allocation5 + $0x34] ss:$12 sps:$4 sm:$0xff]   ;;  %v1634_v14 = vld [vmem:[#allocation5 + $0x1c] ss:$12 sps:$4 sm:$0xff]  }
  0x2e   :  { %v1636_v15 = vld [vmem:[#allocation5 + $0x18] ss:$12 sps:$4 sm:$0xff]   ;;  %v1655_v17 = vld [vmem:[#allocation5 + $0xb0] ss:$12 sps:$4 sm:$0xff]   ;;  %v1639_v18 = vld [vmem:[#allocation5] ss:$12 sps:$4 sm:$0xff]  }
  0x2f   :  { %371 = vmatpush1.bf16.msra.mxu0 %v1621_v4  ;;  %v1637_v16 = vld [vmem:[#allocation5 + $0x4] ss:$12 sps:$4 sm:$0xff]   ;;  %1508 = vmatprep.subr.bf16.mxu1 %v1655_v17  ;;  %v1658_v20 = vld [vmem:[#allocation5 + $0x80] ss:$12 sps:$4 sm:$0xff]   ;;  %v1659_v21 = vld [vmem:[#allocation5 + $0x68] ss:$12 sps:$4 sm:$0xff]  }
  0x30   :  { %372 = vmatprep.subr.bf16.mxu0 %v1622_v5  ;;  %v1657_v19 = vld [vmem:[#allocation5 + $0x98] ss:$12 sps:$4 sm:$0xff]   ;;  %1509 = vmatpush3.bf16.msra.mxu1 %v1655_v17  ;;  %v1641_v22 = vld [vmem:[#allocation2 + $0x8] sm:$0xff]   ;;  %v1660_v23 = vld [vmem:[#allocation5 + $0x50] ss:$12 sps:$4 sm:$0xff]   ;;  %v130_v50 = vshrl.u32 %v129_v49, 7 }
  0x31   :  { %1510 = vmatprep.subr.bf16.mxu1 %v1657_v19  ;;  %v1661_v24 = vld [vmem:[#allocation5 + $0x38] ss:$12 sps:$4 sm:$0xff]   ;;  %v1642_v25 = vld [vmem:[#allocation2 + $0x10] sm:$0xff]   ;;  %v1662_v26 = vld [vmem:[#allocation5 + $0x20] ss:$12 sps:$4 sm:$0xff]  }
  0x32   :  { %v1663_v27 = vld [vmem:[#allocation5 + $0x8] ss:$12 sps:$4 sm:$0xff]   ;;  %v1643_v28 = vld [vmem:[#allocation2 + $0x18] sm:$0xff]   ;;  %v1644_v31 = vld [vmem:[#allocation2 + $0x20] sm:$0xff]   ;;  %v135_v51 = vsub.s32 1, %v130_v50  ;;  %v131_v52 = vsub.s32 0, %v130_v50 }
  0x33   :  { %373 = vmatpush1.bf16.msra.mxu0 %v1624_v6  ;;  %v1664_v29 = vld [vmem:[#allocation7 + $0x38] sm:$0xff]   ;;  %v1665_v30 = vld [vmem:[#allocation7 + $0x30] sm:$0xff]   ;;  %v1666_v32 = vld [vmem:[#allocation7 + $0x28] sm:$0xff]   ;;  %v139_v17 = vsub.s32 2, %v130_v50 }
  0x34   :  { %374 = vmatprep.subr.bf16.mxu0 %v1625_v7  ;;  %1511 = vmatpush3.bf16.msra.mxu1 %v1657_v19  ;;  %v1645_v33 = vld [vmem:[#allocation2 + $0x28] sm:$0xff]   ;;  %v1646_v34 = vld [vmem:[#allocation2 + $0x30] sm:$0xff]   ;;  %v1647_v35 = vld [vmem:[#allocation2 + $0x38] sm:$0xff]  }
  0x35   :  { %1512 = vmatprep.subr.bf16.mxu1 %v1658_v20  ;;  %v1648_v36 = vld [vmem:[#allocation2 + $0x40] sm:$0xff]   ;;  %v1649_v37 = vld [vmem:[#allocation2 + $0x48] sm:$0xff]   ;;  %v1650_v38 = vld [vmem:[#allocation2 + $0x50] sm:$0xff]  }
  0x36   :  { %v1667_v39 = vld [vmem:[#allocation7 + $0x20] sm:$0xff]   ;;  %v1651_v40 = vld [vmem:[#allocation2 + $0x58] sm:$0xff]   ;;  %v1669_v43 = vld [vmem:[#allocation7 + $0x10] sm:$0xff]  }
  0x37   :  { %375 = vmatpush1.bf16.msra.mxu0 %v1627_v8  ;;  %v1652_v41 = vld [vmem:[#allocation2 + $0x60] sm:$0xff]   ;;  %v1668_v42 = vld [vmem:[#allocation7 + $0x18] sm:$0xff]   ;;  %v1653_v44 = vld [vmem:[#allocation2 + $0x68] sm:$0xff]  }
  0x38   :  { %376 = vmatprep.subr.bf16.mxu0 %v1628_v10  ;;  %1513 = vmatpush3.bf16.msra.mxu1 %v1658_v20  ;;  %v1654_v45 = vld [vmem:[#allocation2 + $0x70] sm:$0xff]   ;;  %v1670_v46 = vld [vmem:[#allocation7 + $0x8] sm:$0xff]   ;;  %v1671_v47 = vld [vmem:[#allocation7] sm:$0xff]  }
  0x39   :  { %1514 = vmatprep.subr.bf16.mxu1 %v1659_v21  ;;  %v1656_v48 = vld [vmem:[#allocation2 + $0x78] sm:$0xff]   ;;  %v127_v53 = vld [vmem:[%s1969_s2] sm:$0x7]  ;;  %s1788_s2 = smov [#allocation8]  }
  0x3a   :  { %v1856_v55 = vrot.slane %v127_v53, %v135_v51  ;;  %v1858_v57 = vrot.slane %v127_v53, %v131_v52  ;;  %s1224_s11 = sshll.u32 %s1788_s2, 4  ;;  %s1225_s11 = int_to_ptr.vmem [resolvable:$true] %s1224_s11 }
  0x3b   :  { %377 = vmatpush1.bf16.msra.mxu0 %v1630_v11  ;;  %s1732_s12 = scalar_lea.vmem %s1225_s11, 2048  ;;  %p1737_p2 = scmp.lt.s32.totalorder %s1225_s11, %s1225_s11 }
  0x3c   :  { %378 = vmatprep.subr.bf16.mxu0 %v1631_v12  ;;  %1515 = vmatpush3.bf16.msra.mxu1 %v1659_v21  ;;  %p1733_p1 = scmp.ne.s32.totalorder %s1225_s11, %s1732_s12  ;;  %p1738_p3 = scmp.lt.s32.totalorder %s1732_s12, %s1732_s12 }
  0x3d   :  { %1516 = vmatprep.subr.bf16.mxu1 %v1660_v23 }
  0x3e   :  { %p1739_p4 = por %p1738_p3, %p1737_p2 }
  0x3f   :  { %379 = vmatpush1.bf16.msra.mxu0 %v1633_v13 }
  0x40   :  { %380 = vmatprep.subr.bf16.mxu0 %v1634_v14  ;;  %1517 = vmatpush3.bf16.msra.mxu1 %v1660_v23  ;;  %p1740_p5 = pnand %p1739_p4, %p1733_p1 }
  0x41   :  { %1518 = vmatprep.subr.bf16.mxu1 %v1661_v24 }
  0x43   :  { %381 = vmatpush1.bf16.msra.mxu0 %v1636_v15 }
  0x44   :  { %382 = vmatprep.subr.bf16.mxu0 %v1637_v16  ;;  %1519 = vmatpush3.bf16.msra.mxu1 %v1661_v24 }
  0x45   :  { %1520 = vmatprep.subr.bf16.mxu1 %v1662_v26 }
  0x47   :  { %383 = vmatpush1.bf16.msra.mxu0 %v1639_v18 }
  0x48   :  { %1521 = vmatpush3.bf16.msra.mxu1 %v1662_v26  ;;  %v1872_v26 = vrot.slane %v127_v53, %v139_v17 }
  0x49   :  { %1522 = vmatprep.subr.bf16.mxu1 %v1663_v27 }
  0x4a   :  { %401 = vmatmul.mubr.bf16.vlgmr.msra.gmra.mxu0 %v1640_v9 }
  0x4b   :  { %410 = vmatprep.mubr.bf16.mxu0 %v1787_v0 }
  0x4c   :  { %1523 = vmatpush3.bf16.msra.mxu1 %v1663_v27 }
  0x4d   :  { %1556 = vmatprep.subr.bf16.mxu1 %v1664_v29 }
  0x4f   :  { %1525 = vmatmul.mubr.bf16.vlgmr.msra.gmra.mxu1 %v1641_v22 }
  0x50   :  { %1528 = vmatprep.mubr.bf16.mxu1 %v1642_v25  ;;  %1557 = vmatpush3.bf16.msra.mxu1 %v1664_v29 }
  0x51   :  { %1558 = vmatprep.subr.bf16.mxu1 %v1665_v30 }
  0x52   :  { %411 = vmatmul.mubr.bf16.gmra.mxu0 %v1641_v22 }
  0x53   :  { %420 = vmatprep.mubr.bf16.mxu0 %v1787_v0 }
  0x54   :  { %1559 = vmatpush3.bf16.msra.mxu1 %v1665_v30 }
  0x55   :  { %1560 = vmatprep.subr.bf16.mxu1 %v1666_v32 }
  0x57   :  { %1529 = vmatmul.mubr.bf16.gmra.mxu1 %v1643_v28 }
  0x58   :  { %1532 = vmatprep.mubr.bf16.mxu1 %v1644_v31  ;;  %1561 = vmatpush3.bf16.msra.mxu1 %v1666_v32 }
  0x59   :  { %1562 = vmatprep.subr.bf16.mxu1 %v1667_v39 }
  0x5a   :  { %421 = vmatmul.mubr.bf16.gmra.mxu0 %v1642_v25 }
  0x5b   :  { %430 = vmatprep.mubr.bf16.mxu0 %v1787_v0 }
  0x5c   :  { %1563 = vmatpush3.bf16.msra.mxu1 %v1667_v39 }
  0x5d   :  { %1564 = vmatprep.subr.bf16.mxu1 %v1668_v42 }
  0x5f   :  { %1533 = vmatmul.mubr.bf16.gmra.mxu1 %v1645_v33 }
  0x60   :  { %1536 = vmatprep.mubr.bf16.mxu1 %v1646_v34  ;;  %1565 = vmatpush3.bf16.msra.mxu1 %v1668_v42 }
  0x61   :  { %1566 = vmatprep.subr.bf16.mxu1 %v1669_v43 }
  0x62   :  { %431 = vmatmul.mubr.bf16.gmra.mxu0 %v1643_v28 }
  0x63   :  { %440 = vmatprep.mubr.bf16.mxu0 %v1787_v0 }
  0x64   :  { %1567 = vmatpush3.bf16.msra.mxu1 %v1669_v43 }
  0x65   :  { %1568 = vmatprep.subr.bf16.mxu1 %v1670_v46 }
  0x67   :  { %1537 = vmatmul.mubr.bf16.gmra.mxu1 %v1647_v35 }
  0x68   :  { %1540 = vmatprep.mubr.bf16.mxu1 %v1648_v36  ;;  %1569 = vmatpush3.bf16.msra.mxu1 %v1670_v46 }
  0x69   :  { %1570 = vmatprep.subr.bf16.mxu1 %v1671_v47 }
  0x6a   :  { %441 = vmatmul.mubr.bf16.gmra.mxu0 %v1644_v31 }
  0x6b   :  { %450 = vmatprep.mubr.bf16.mxu0 %v1787_v0 }
  0x6c   :  { %1571 = vmatpush3.bf16.msra.mxu1 %v1671_v47 }
  0x6f   :  { %1541 = vmatmul.mubr.bf16.gmra.mxu1 %v1649_v37 }
  0x70   :  { %1544 = vmatprep.mubr.bf16.mxu1 %v1650_v38 }
  0x72   :  { %451 = vmatmul.mubr.bf16.gmra.mxu0 %v1645_v33 }
  0x73   :  { %460 = vmatprep.mubr.bf16.mxu0 %v1787_v0 }
  0x77   :  { %1545 = vmatmul.mubr.bf16.gmra.mxu1 %v1651_v40 }
  0x78   :  { %1548 = vmatprep.mubr.bf16.mxu1 %v1652_v41 }
  0x7a   :  { %461 = vmatmul.mubr.bf16.gmra.mxu0 %v1646_v34 }
  0x7b   :  { %470 = vmatprep.mubr.bf16.mxu0 %v1787_v0 }
  0x7f   :  { %1549 = vmatmul.mubr.bf16.gmra.mxu1 %v1653_v44 }
  0x80   :  { %1552 = vmatprep.mubr.bf16.mxu1 %v1654_v45 }
  0x82   :  { %471 = vmatmul.mubr.bf16.gmra.mxu0 %v1647_v35 }
  0x83   :  { %480 = vmatprep.mubr.bf16.mxu0 %v1787_v0 }
  0x87   :  { %1553 = vmatmul.mubr.bf16.gmra.mxu1 %v1656_v48 }
  0x8a   :  { %481 = vmatmul.mubr.bf16.gmra.mxu0 %v1648_v36 }
  0x8b   :  { %490 = vmatprep.mubr.bf16.mxu0 %v1787_v0 }
  0x92   :  { %491 = vmatmul.mubr.bf16.gmra.mxu0 %v1649_v37 }
  0x93   :  { %500 = vmatprep.mubr.bf16.mxu0 %v1787_v0 }
  0x9a   :  { %501 = vmatmul.mubr.bf16.gmra.mxu0 %v1650_v38 }
  0x9b   :  { %510 = vmatprep.mubr.bf16.mxu0 %v1787_v0 }
  0xa2   :  { %511 = vmatmul.mubr.bf16.gmra.mxu0 %v1651_v40 }
  0xa3   :  { %520 = vmatprep.mubr.bf16.mxu0 %v1787_v0 }
  0xaa   :  { %521 = vmatmul.mubr.bf16.gmra.mxu0 %v1652_v41 }
  0xab   :  { %530 = vmatprep.mubr.bf16.mxu0 %v1787_v0 }
  0xb2   :  { %531 = vmatmul.mubr.bf16.gmra.mxu0 %v1653_v44 }
  0xb3   :  { %540 = vmatprep.mubr.bf16.mxu0 %v1787_v0 }
  0xba   :  { %541 = vmatmul.mubr.bf16.gmra.mxu0 %v1654_v45 }
  0xbb   :  { %550 = vmatprep.mubr.bf16.mxu0 %v1787_v0 }
  0xc2   :  { %551 = vmatmul.mubr.bf16.gmra.mxu0 %v1656_v48 }
 0x10a   :  { %v402_v54 = vpop.f32.mrf.mxu0 }
 0x10b   :  { %v403_v61 = vadd.f32 %v402_v54, %v1858_v57 }
 0x10c   :  { %v404_v56 = vpop.f32.mrf.mxu0 }
 0x10d   :  { %v405_v59 = vadd.f32 %v404_v56, %v1856_v55 }
 0x10e   :  { %v406_v58 = vpop.f32.mrf.mxu0 }
 0x10f   :  { %v407_v62 = vadd.f32 %v406_v58, %v1858_v57  ;;  %v882_v1 = vmul.f32 %v405_v59, %v403_v61  ;;  %v1526_v28 = vpop.f32.mrf.mxu1 }
 0x110   :  { %v408_v60 = vpop.f32.mrf.mxu0  ;;  %v604_v33 = vadd.f32 %v1526_v28, %v1872_v26 }
 0x111   :  { %v409_v63 = vadd.f32 %v408_v60, %v1856_v55  ;;  %v595_v31 = vpop.f32.mrf.mxu1 }
 0x112   :  { %v412_v0 = vpop.f32.mrf.mxu0  ;;  %v596_v39 = vadd.f32 %v595_v31, %v1872_v26 }
 0x113   :  { %v883_v2 = vmul.f32 %v409_v63, %v407_v62  ;;  %v413_v8 = vadd.f32 %v412_v0, %v1858_v57  ;;  %v1527_v36 = vpop.f32.mrf.mxu1 }
 0x114   :  { %v414_v3 = vpop.f32.mrf.mxu0  ;;  %v607_v40 = vadd.f32 %v1527_v36, %v1872_v26 }
 0x115   :  { %v914_v4 = vpack.c.bf16 %v883_v2, %v882_v1  ;;  %v415_v6 = vadd.f32 %v414_v3, %v1856_v55  ;;  %v598_v42 = vpop.f32.mrf.mxu1 }
 0x116   :  { %v416_v5 = vpop.f32.mrf.mxu0  ;;  %v1373_v45 = vpack.c.bf16 %v607_v40, %v604_v33  ;;  %v599_v46 = vadd.f32 %v598_v42, %v1872_v26 }
 0x117   :  { %1572 = vmatprep.mubr.bf16.mxu1 %v914_v4  ;;  %v417_v9 = vadd.f32 %v416_v5, %v1858_v57  ;;  %v884_v12 = vmul.f32 %v415_v6, %v413_v8  ;;  %v1530_v48 = vpop.f32.mrf.mxu1 }
 0x118   :  { %v418_v7 = vpop.f32.mrf.mxu0  ;;  %1445 = vst [vmem:[#allocation8 + $0x8] sm:$0xff] %v1373_v45   ;;  %v1368_v50 = vpack.c.bf16 %v599_v46, %v596_v39  ;;  %v620_v54 = vadd.f32 %v1530_v48, %v1872_v26 }
 0x119   :  { %v419_v10 = vadd.f32 %v418_v7, %v1856_v55  ;;  %v611_v52 = vpop.f32.mrf.mxu1 }
 0x11a   :  { %v422_v11 = vpop.f32.mrf.mxu0  ;;  %1369 = vst [vmem:[#allocation8] sm:$0xff] %v1368_v50   ;;  %v612_v62 = vadd.f32 %v611_v52, %v1872_v26 }
 0x11b   :  { %v885_v13 = vmul.f32 %v419_v10, %v417_v9  ;;  %v423_v20 = vadd.f32 %v422_v11, %v1858_v57  ;;  %v1531_v59 = vpop.f32.mrf.mxu1 }
 0x11c   :  { %v424_v14 = vpop.f32.mrf.mxu0  ;;  %v623_v63 = vadd.f32 %v1531_v59, %v1872_v26 }
 0x11d   :  { %v915_v15 = vpack.c.bf16 %v885_v13, %v884_v12  ;;  %v425_v18 = vadd.f32 %v424_v14, %v1856_v55  ;;  %v614_v1 = vpop.f32.mrf.mxu1 }
 0x11e   :  { %v426_v16 = vpop.f32.mrf.mxu0  ;;  %v1383_v4 = vpack.c.bf16 %v623_v63, %v620_v54  ;;  %v615_v5 = vadd.f32 %v614_v1, %v1872_v26 }
 0x11f   :  { %1573 = vmatmul.mubr.bf16.vlgmr.msra.gmra.mxu1 %v915_v15  ;;  %v427_v21 = vadd.f32 %v426_v16, %v1858_v57  ;;  %v886_v24 = vmul.f32 %v425_v18, %v423_v20  ;;  %v1534_v7 = vpop.f32.mrf.mxu1 }
 0x120   :  { %v428_v19 = vpop.f32.mrf.mxu0  ;;  %1447 = vst [vmem:[#allocation8 + $0x18] sm:$0xff] %v1383_v4   ;;  %v1378_v9 = vpack.c.bf16 %v615_v5, %v612_v62  ;;  %v636_v13 = vadd.f32 %v1534_v7, %v1872_v26 }
 0x121   :  { %v429_v22 = vadd.f32 %v428_v19, %v1856_v55  ;;  %v627_v11 = vpop.f32.mrf.mxu1 }
 0x122   :  { %v432_v23 = vpop.f32.mrf.mxu0  ;;  %1446 = vst [vmem:[#allocation8 + $0x10] sm:$0xff] %v1378_v9   ;;  %v628_v19 = vadd.f32 %v627_v11, %v1872_v26 }
 0x123   :  { %v887_v25 = vmul.f32 %v429_v22, %v427_v21  ;;  %v433_v34 = vadd.f32 %v432_v23, %v1858_v57  ;;  %v1535_v16 = vpop.f32.mrf.mxu1 }
 0x124   :  { %v434_v27 = vpop.f32.mrf.mxu0  ;;  %v639_v20 = vadd.f32 %v1535_v16, %v1872_v26 }
 0x125   :  { %v916_v29 = vpack.c.bf16 %v887_v25, %v886_v24  ;;  %v435_v32 = vadd.f32 %v434_v27, %v1856_v55  ;;  %v630_v22 = vpop.f32.mrf.mxu1 }
 0x126   :  { %v436_v30 = vpop.f32.mrf.mxu0  ;;  %v1393_v25 = vpack.c.bf16 %v639_v20, %v636_v13  ;;  %v631_v27 = vadd.f32 %v630_v22, %v1872_v26 }
 0x127   :  { %1576 = vmatprep.mubr.bf16.mxu1 %v916_v29  ;;  %v437_v37 = vadd.f32 %v436_v30, %v1858_v57  ;;  %v888_v43 = vmul.f32 %v435_v32, %v433_v34  ;;  %v1538_v29 = vpop.f32.mrf.mxu1 }
 0x128   :  { %v438_v35 = vpop.f32.mrf.mxu0  ;;  %1449 = vst [vmem:[#allocation8 + $0x28] sm:$0xff] %v1393_v25   ;;  %v1388_v31 = vpack.c.bf16 %v631_v27, %v628_v19 }
 0x129   :  { %v439_v38 = vadd.f32 %v438_v35, %v1856_v55  ;;  %v643_v33 = vpop.f32.mrf.mxu1  ;;  %v652_v35 = vadd.f32 %v1538_v29, %v1872_v26 }
 0x12a   :  { %v442_v41 = vpop.f32.mrf.mxu0  ;;  %1448 = vst [vmem:[#allocation8 + $0x20] sm:$0xff] %v1388_v31  }
 0x12b   :  { %v889_v44 = vmul.f32 %v439_v38, %v437_v37  ;;  %v443_v56 = vadd.f32 %v442_v41, %v1858_v57  ;;  %v1539_v38 = vpop.f32.mrf.mxu1  ;;  %v644_v41 = vadd.f32 %v643_v33, %v1872_v26 }
 0x12c   :  { %v444_v47 = vpop.f32.mrf.mxu0  ;;  %v655_v42 = vadd.f32 %v1539_v38, %v1872_v26 }
 0x12d   :  { %v917_v49 = vpack.c.bf16 %v889_v44, %v888_v43  ;;  %v445_v53 = vadd.f32 %v444_v47, %v1856_v55  ;;  %v646_v44 = vpop.f32.mrf.mxu1 }
 0x12e   :  { %v446_v51 = vpop.f32.mrf.mxu0  ;;  %v1403_v47 = vpack.c.bf16 %v655_v42, %v652_v35  ;;  %v647_v48 = vadd.f32 %v646_v44, %v1872_v26 }
 0x12f   :  { %1577 = vmatmul.mubr.bf16.gmra.mxu1 %v917_v49  ;;  %v447_v60 = vadd.f32 %v446_v51, %v1858_v57  ;;  %v890_v2 = vmul.f32 %v445_v53, %v443_v56  ;;  %v1542_v50 = vpop.f32.mrf.mxu1 }
 0x130   :  { %v448_v58 = vpop.f32.mrf.mxu0  ;;  %1451 = vst [vmem:[#allocation8 + $0x38] sm:$0xff] %v1403_v47   ;;  %v1398_v52 = vpack.c.bf16 %v647_v48, %v644_v41 }
 0x131   :  { %v449_v61 = vadd.f32 %v448_v58, %v1856_v55  ;;  %v659_v54 = vpop.f32.mrf.mxu1  ;;  %v668_v58 = vadd.f32 %v1542_v50, %v1872_v26 }
 0x132   :  { %v452_v0 = vpop.f32.mrf.mxu0  ;;  %1450 = vst [vmem:[#allocation8 + $0x30] sm:$0xff] %v1398_v52  }
 0x133   :  { %v891_v3 = vmul.f32 %v449_v61, %v447_v60  ;;  %v453_v14 = vadd.f32 %v452_v0, %v1858_v57  ;;  %v1543_v61 = vpop.f32.mrf.mxu1  ;;  %v660_v0 = vadd.f32 %v659_v54, %v1872_v26 }
 0x134   :  { %v454_v6 = vpop.f32.mrf.mxu0  ;;  %v671_v1 = vadd.f32 %v1543_v61, %v1872_v26 }
 0x135   :  { %v918_v8 = vpack.c.bf16 %v891_v3, %v890_v2  ;;  %v455_v12 = vadd.f32 %v454_v6, %v1856_v55  ;;  %v662_v3 = vpop.f32.mrf.mxu1 }
 0x136   :  { %v456_v10 = vpop.f32.mrf.mxu0  ;;  %v1413_v6 = vpack.c.bf16 %v671_v1, %v668_v58  ;;  %v663_v7 = vadd.f32 %v662_v3, %v1872_v26 }
 0x137   :  { %1580 = vmatprep.mubr.bf16.mxu1 %v918_v8  ;;  %v457_v17 = vadd.f32 %v456_v10, %v1858_v57  ;;  %v892_v23 = vmul.f32 %v455_v12, %v453_v14  ;;  %v1546_v9 = vpop.f32.mrf.mxu1 }
 0x138   :  { %v458_v15 = vpop.f32.mrf.mxu0  ;;  %1453 = vst [vmem:[#allocation8 + $0x48] sm:$0xff] %v1413_v6   ;;  %v1408_v11 = vpack.c.bf16 %v663_v7, %v660_v0 }
 0x139   :  { %v459_v18 = vadd.f32 %v458_v15, %v1856_v55  ;;  %v675_v13 = vpop.f32.mrf.mxu1  ;;  %v684_v15 = vadd.f32 %v1546_v9, %v1872_v26 }
 0x13a   :  { %v462_v21 = vpop.f32.mrf.mxu0  ;;  %1452 = vst [vmem:[#allocation8 + $0x40] sm:$0xff] %v1408_v11  }
 0x13b   :  { %v893_v24 = vmul.f32 %v459_v18, %v457_v17  ;;  %v463_v36 = vadd.f32 %v462_v21, %v1858_v57  ;;  %v1547_v18 = vpop.f32.mrf.mxu1  ;;  %v676_v21 = vadd.f32 %v675_v13, %v1872_v26 }
 0x13c   :  { %v464_v28 = vpop.f32.mrf.mxu0  ;;  %v687_v22 = vadd.f32 %v1547_v18, %v1872_v26 }
 0x13d   :  { %v919_v30 = vpack.c.bf16 %v893_v24, %v892_v23  ;;  %v465_v34 = vadd.f32 %v464_v28, %v1856_v55  ;;  %v678_v24 = vpop.f32.mrf.mxu1 }
 0x13e   :  { %v466_v32 = vpop.f32.mrf.mxu0  ;;  %v1423_v28 = vpack.c.bf16 %v687_v22, %v684_v15  ;;  %v679_v29 = vadd.f32 %v678_v24, %v1872_v26 }
 0x13f   :  { %1581 = vmatmul.mubr.bf16.gmra.mxu1 %v919_v30  ;;  %v467_v39 = vadd.f32 %v466_v32, %v1858_v57  ;;  %v894_v45 = vmul.f32 %v465_v34, %v463_v36  ;;  %v1550_v31 = vpop.f32.mrf.mxu1 }
 0x140   :  { %v468_v37 = vpop.f32.mrf.mxu0  ;;  %1455 = vst [vmem:[#allocation8 + $0x58] sm:$0xff] %v1423_v28   ;;  %v1418_v33 = vpack.c.bf16 %v679_v29, %v676_v21 }
 0x141   :  { %v469_v40 = vadd.f32 %v468_v37, %v1856_v55  ;;  %v691_v35 = vpop.f32.mrf.mxu1  ;;  %v700_v37 = vadd.f32 %v1550_v31, %v1872_v26 }
 0x142   :  { %v472_v43 = vpop.f32.mrf.mxu0  ;;  %1454 = vst [vmem:[#allocation8 + $0x50] sm:$0xff] %v1418_v33  }
 0x143   :  { %v895_v46 = vmul.f32 %v469_v40, %v467_v39  ;;  %v473_v59 = vadd.f32 %v472_v43, %v1858_v57  ;;  %v1551_v40 = vpop.f32.mrf.mxu1  ;;  %v692_v43 = vadd.f32 %v691_v35, %v1872_v26 }
 0x144   :  { %v474_v49 = vpop.f32.mrf.mxu0  ;;  %v703_v44 = vadd.f32 %v1551_v40, %v1872_v26 }
 0x145   :  { %v920_v51 = vpack.c.bf16 %v895_v46, %v894_v45  ;;  %v475_v56 = vadd.f32 %v474_v49, %v1856_v55  ;;  %v694_v46 = vpop.f32.mrf.mxu1 }
 0x146   :  { %v476_v53 = vpop.f32.mrf.mxu0  ;;  %v1433_v49 = vpack.c.bf16 %v703_v44, %v700_v37  ;;  %v695_v50 = vadd.f32 %v694_v46, %v1872_v26 }
 0x147   :  { %1584 = vmatprep.mubr.bf16.mxu1 %v920_v51  ;;  %v477_v62 = vadd.f32 %v476_v53, %v1858_v57  ;;  %v896_v4 = vmul.f32 %v475_v56, %v473_v59  ;;  %v1554_v52 = vpop.f32.mrf.mxu1 }
 0x148   :  { %v478_v60 = vpop.f32.mrf.mxu0  ;;  %1457 = vst [vmem:[#allocation8 + $0x68] sm:$0xff] %v1433_v49   ;;  %v1428_v54 = vpack.c.bf16 %v695_v50, %v692_v43 }
 0x149   :  { %v479_v63 = vadd.f32 %v478_v60, %v1856_v55  ;;  %v707_v58 = vpop.f32.mrf.mxu1  ;;  %v716_v60 = vadd.f32 %v1554_v52, %v1872_v26 }
 0x14a   :  { %v482_v2 = vpop.f32.mrf.mxu0  ;;  %1456 = vst [vmem:[#allocation8 + $0x60] sm:$0xff] %v1428_v54  }
 0x14b   :  { %v897_v5 = vmul.f32 %v479_v63, %v477_v62  ;;  %v483_v16 = vadd.f32 %v482_v2, %v1858_v57  ;;  %v1555_v63 = vpop.f32.mrf.mxu1  ;;  %v708_v2 = vadd.f32 %v707_v58, %v1872_v26 }
 0x14c   :  { %v484_v8 = vpop.f32.mrf.mxu0  ;;  %v719_v3 = vadd.f32 %v1555_v63, %v1872_v26 }
 0x14d   :  { %v921_v10 = vpack.c.bf16 %v897_v5, %v896_v4  ;;  %v485_v14 = vadd.f32 %v484_v8, %v1856_v55  ;;  %v710_v5 = vpop.f32.mrf.mxu1 }
 0x14e   :  { %v486_v12 = vpop.f32.mrf.mxu0  ;;  %v1443_v8 = vpack.c.bf16 %v719_v3, %v716_v60  ;;  %v711_v9 = vadd.f32 %v710_v5, %v1872_v26 }
 0x14f   :  { %1585 = vmatmul.mubr.bf16.gmra.mxu1 %v921_v10  ;;  %v487_v19 = vadd.f32 %v486_v12, %v1858_v57  ;;  %v898_v25 = vmul.f32 %v485_v14, %v483_v16 }
 0x150   :  { %v488_v17 = vpop.f32.mrf.mxu0  ;;  %1459 = vst [vmem:[#allocation8 + $0x78] sm:$0xff] %v1443_v8   ;;  %v1438_v12 = vpack.c.bf16 %v711_v9, %v708_v2 }
 0x151   :  { %v489_v20 = vadd.f32 %v488_v17, %v1856_v55 }
 0x152   :  { %v492_v23 = vpop.f32.mrf.mxu0  ;;  %1458 = vst [vmem:[#allocation8 + $0x70] sm:$0xff] %v1438_v12  }
 0x153   :  { %v899_v27 = vmul.f32 %v489_v20, %v487_v19  ;;  %v493_v38 = vadd.f32 %v492_v23, %v1858_v57 }
 0x154   :  { %v494_v30 = vpop.f32.mrf.mxu0 }
 0x155   :  { %v922_v32 = vpack.c.bf16 %v899_v27, %v898_v25  ;;  %v495_v36 = vadd.f32 %v494_v30, %v1856_v55 }
 0x156   :  { %v496_v34 = vpop.f32.mrf.mxu0 }
 0x157   :  { %1588 = vmatprep.mubr.bf16.mxu1 %v922_v32  ;;  %v497_v41 = vadd.f32 %v496_v34, %v1858_v57  ;;  %v900_v47 = vmul.f32 %v495_v36, %v493_v38 }
 0x158   :  { %v498_v39 = vpop.f32.mrf.mxu0 }
 0x159   :  { %v499_v42 = vadd.f32 %v498_v39, %v1856_v55 }
 0x15a   :  { %v502_v45 = vpop.f32.mrf.mxu0 }
 0x15b   :  { %v901_v48 = vmul.f32 %v499_v42, %v497_v41  ;;  %v503_v61 = vadd.f32 %v502_v45, %v1858_v57 }
 0x15c   :  { %v504_v51 = vpop.f32.mrf.mxu0 }
 0x15d   :  { %v923_v53 = vpack.c.bf16 %v901_v48, %v900_v47  ;;  %v505_v59 = vadd.f32 %v504_v51, %v1856_v55 }
 0x15e   :  { %v506_v56 = vpop.f32.mrf.mxu0 }
 0x15f   :  { %1589 = vmatmul.mubr.bf16.gmra.mxu1 %v923_v53  ;;  %v507_v0 = vadd.f32 %v506_v56, %v1858_v57  ;;  %v902_v6 = vmul.f32 %v505_v59, %v503_v61 }
 0x160   :  { %v508_v62 = vpop.f32.mrf.mxu0 }
 0x161   :  { %v509_v1 = vadd.f32 %v508_v62, %v1856_v55 }
 0x162   :  { %v512_v4 = vpop.f32.mrf.mxu0 }
 0x163   :  { %v903_v7 = vmul.f32 %v509_v1, %v507_v0  ;;  %v513_v16 = vadd.f32 %v512_v4, %v1858_v57 }
 0x164   :  { %v514_v10 = vpop.f32.mrf.mxu0 }
 0x165   :  { %v924_v11 = vpack.c.bf16 %v903_v7, %v902_v6  ;;  %v515_v14 = vadd.f32 %v514_v10, %v1856_v55 }
 0x166   :  { %v516_v13 = vpop.f32.mrf.mxu0 }
 0x167   :  { %1592 = vmatprep.mubr.bf16.mxu1 %v924_v11  ;;  %v517_v17 = vadd.f32 %v516_v13, %v1858_v57  ;;  %v904_v20 = vmul.f32 %v515_v14, %v513_v16 }
 0x168   :  { %v518_v15 = vpop.f32.mrf.mxu0 }
 0x169   :  { %v519_v18 = vadd.f32 %v518_v15, %v1856_v55 }
 0x16a   :  { %v522_v19 = vpop.f32.mrf.mxu0 }
 0x16b   :  { %v905_v21 = vmul.f32 %v519_v18, %v517_v17  ;;  %v523_v27 = vadd.f32 %v522_v19, %v1858_v57 }
 0x16c   :  { %v524_v26 = vpop.f32.mrf.mxu0 }
 0x16d   :  { %v925_v22 = vpack.c.bf16 %v905_v21, %v904_v20  ;;  %v525_v24 = vadd.f32 %v524_v26, %v1856_v55 }
 0x16e   :  { %v526_v23 = vpop.f32.mrf.mxu0 }
 0x16f   :  { %1593 = vmatmul.mubr.bf16.gmra.mxu1 %v925_v22  ;;  %v527_v28 = vadd.f32 %v526_v23, %v1858_v57  ;;  %v906_v31 = vmul.f32 %v525_v24, %v523_v27 }
 0x170   :  { %v528_v25 = vpop.f32.mrf.mxu0 }
 0x171   :  { %v529_v29 = vadd.f32 %v528_v25, %v1856_v55 }
 0x172   :  { %v532_v30 = vpop.f32.mrf.mxu0 }
 0x173   :  { %v907_v32 = vmul.f32 %v529_v29, %v527_v28  ;;  %v533_v38 = vadd.f32 %v532_v30, %v1858_v57 }
 0x174   :  { %v534_v33 = vpop.f32.mrf.mxu0 }
 0x175   :  { %v926_v34 = vpack.c.bf16 %v907_v32, %v906_v31  ;;  %v535_v36 = vadd.f32 %v534_v33, %v1856_v55 }
 0x176   :  { %v536_v35 = vpop.f32.mrf.mxu0 }
 0x177   :  { %1596 = vmatprep.mubr.bf16.mxu1 %v926_v34  ;;  %v537_v39 = vadd.f32 %v536_v35, %v1858_v57  ;;  %v908_v42 = vmul.f32 %v535_v36, %v533_v38 }
 0x178   :  { %v538_v37 = vpop.f32.mrf.mxu0 }
 0x179   :  { %v539_v40 = vadd.f32 %v538_v37, %v1856_v55 }
 0x17a   :  { %v542_v41 = vpop.f32.mrf.mxu0 }
 0x17b   :  { %v909_v43 = vmul.f32 %v539_v40, %v537_v39  ;;  %v543_v49 = vadd.f32 %v542_v41, %v1858_v57 }
 0x17c   :  { %v544_v44 = vpop.f32.mrf.mxu0 }
 0x17d   :  { %v927_v45 = vpack.c.bf16 %v909_v43, %v908_v42  ;;  %v545_v47 = vadd.f32 %v544_v44, %v1856_v55 }
 0x17e   :  { %v546_v46 = vpop.f32.mrf.mxu0 }
 0x17f   :  { %1597 = vmatmul.mubr.bf16.gmra.mxu1 %v927_v45  ;;  %v547_v50 = vadd.f32 %v546_v46, %v1858_v57  ;;  %v910_v53 = vmul.f32 %v545_v47, %v543_v49 }
 0x180   :  { %v548_v48 = vpop.f32.mrf.mxu0 }
 0x181   :  { %v549_v51 = vadd.f32 %v548_v48, %v1856_v55 }
 0x182   :  { %v552_v52 = vpop.f32.mrf.mxu0 }
 0x183   :  { %v911_v54 = vmul.f32 %v549_v51, %v547_v50  ;;  %v553_v62 = vadd.f32 %v552_v52, %v1858_v57 }
 0x184   :  { %v554_v56 = vpop.f32.mrf.mxu0 }
 0x185   :  { %v928_v58 = vpack.c.bf16 %v911_v54, %v910_v53  ;;  %v555_v60 = vadd.f32 %v554_v56, %v1856_v55 }
 0x186   :  { %v556_v59 = vpop.f32.mrf.mxu0 }
 0x187   :  { %1600 = vmatprep.mubr.bf16.mxu1 %v928_v58  ;;  %v557_v63 = vadd.f32 %v556_v59, %v1858_v57  ;;  %v912_v1 = vmul.f32 %v555_v60, %v553_v62 }
 0x188   :  { %v558_v61 = vpop.f32.mrf.mxu0 }
 0x189   :  { %v559_v0 = vadd.f32 %v558_v61, %v1856_v55 }
 0x18b   :  { %v913_v2 = vmul.f32 %v559_v0, %v557_v63 }
 0x18d   :  { %v929_v3 = vpack.c.bf16 %v913_v2, %v912_v1 }
 0x18f   :  { %1601 = vmatmul.mubr.bf16.gmra.mxu1 %v929_v3 }
 0x190   :  { %1743 = shalt.err (!%p1740_p5)
}
 0x191   :  { %1230 = dma.vmem_to_hbm [thread:$0]  %s1225_s11, 2048, %s1971_s4, [#allocation4], %s1784_s28, %s1784_s28, %s1785_s29  }
 0x192   :  { %s1789_s4 = smov [#allocation9]  }
 0x193   :  { %s1236_s15 = sshll.u32 %s1789_s4, 4  ;;  %s1237_s15 = int_to_ptr.vmem [resolvable:$true] %s1236_s15 }
 0x194   :  { %s1752_s16 = scalar_lea.vmem %s1237_s15, 4096  ;;  %p1757_p7 = scmp.lt.s32.totalorder %s1237_s15, %s1237_s15 }
 0x195   :  { %p1753_p6 = scmp.ne.s32.totalorder %s1237_s15, %s1752_s16  ;;  %p1758_p8 = scmp.lt.s32.totalorder %s1752_s16, %s1752_s16 }
 0x197   :  { %p1759_p9 = por %p1758_p8, %p1757_p7 }
 0x199   :  { %p1760_p10 = pnand %p1759_p9, %p1753_p6 }
 0x1df   :  { %v1574_v55 = vpop.f32.mrf.mxu1 }
 0x1e0   :  { %v1157_v57 = vmul.f32 0.17677669, %v1574_v55 }
 0x1e1   :  { %v1028_v4 = vpop.f32.mrf.mxu1 }
 0x1e2   :  { %1189 = vst [vmem:[#allocation9 + $0x10] sm:$0xff] %v1157_v57  ;;  %v1155_v5 = vmul.f32 0.17677669, %v1028_v4 }
 0x1e3   :  { %v1575_v6 = vpop.f32.mrf.mxu1 }
 0x1e4   :  { %1187 = vst [vmem:[#allocation9] sm:$0xff] %v1155_v5  ;;  %v1158_v7 = vmul.f32 0.17677669, %v1575_v6 }
 0x1e5   :  { %v1031_v8 = vpop.f32.mrf.mxu1 }
 0x1e6   :  { %1190 = vst [vmem:[#allocation9 + $0x18] sm:$0xff] %v1158_v7  ;;  %v1156_v9 = vmul.f32 0.17677669, %v1031_v8 }
 0x1e8   :  { %1188 = vst [vmem:[#allocation9 + $0x8] sm:$0xff] %v1156_v9 }
 0x1ef   :  { %v1578_v10 = vpop.f32.mrf.mxu1 }
 0x1f0   :  { %v1161_v11 = vmul.f32 0.17677669, %v1578_v10 }
 0x1f1   :  { %v1044_v12 = vpop.f32.mrf.mxu1 }
 0x1f2   :  { %1193 = vst [vmem:[#allocation9 + $0x30] sm:$0xff] %v1161_v11  ;;  %v1159_v13 = vmul.f32 0.17677669, %v1044_v12 }
 0x1f3   :  { %v1579_v14 = vpop.f32.mrf.mxu1 }
 0x1f4   :  { %1191 = vst [vmem:[#allocation9 + $0x20] sm:$0xff] %v1159_v13  ;;  %v1162_v15 = vmul.f32 0.17677669, %v1579_v14 }
 0x1f5   :  { %v1047_v16 = vpop.f32.mrf.mxu1 }
 0x1f6   :  { %1194 = vst [vmem:[#allocation9 + $0x38] sm:$0xff] %v1162_v15  ;;  %v1160_v17 = vmul.f32 0.17677669, %v1047_v16 }
 0x1f8   :  { %1192 = vst [vmem:[#allocation9 + $0x28] sm:$0xff] %v1160_v17 }
 0x1ff   :  { %v1582_v18 = vpop.f32.mrf.mxu1 }
 0x200   :  { %v1165_v19 = vmul.f32 0.17677669, %v1582_v18 }
 0x201   :  { %v1060_v20 = vpop.f32.mrf.mxu1 }
 0x202   :  { %1197 = vst [vmem:[#allocation9 + $0x50] sm:$0xff] %v1165_v19  ;;  %v1163_v21 = vmul.f32 0.17677669, %v1060_v20 }
 0x203   :  { %v1583_v26 = vpop.f32.mrf.mxu1 }
 0x204   :  { %1195 = vst [vmem:[#allocation9 + $0x40] sm:$0xff] %v1163_v21  ;;  %v1166_v22 = vmul.f32 0.17677669, %v1583_v26 }
 0x205   :  { %v1063_v23 = vpop.f32.mrf.mxu1 }
 0x206   :  { %1198 = vst [vmem:[#allocation9 + $0x58] sm:$0xff] %v1166_v22  ;;  %v1164_v24 = vmul.f32 0.17677669, %v1063_v23 }
 0x208   :  { %1196 = vst [vmem:[#allocation9 + $0x48] sm:$0xff] %v1164_v24 }
 0x20f   :  { %v1586_v25 = vpop.f32.mrf.mxu1 }
 0x210   :  { %v1169_v27 = vmul.f32 0.17677669, %v1586_v25 }
 0x211   :  { %v1076_v28 = vpop.f32.mrf.mxu1 }
 0x212   :  { %1201 = vst [vmem:[#allocation9 + $0x70] sm:$0xff] %v1169_v27  ;;  %v1167_v29 = vmul.f32 0.17677669, %v1076_v28 }
 0x213   :  { %v1587_v30 = vpop.f32.mrf.mxu1 }
 0x214   :  { %1199 = vst [vmem:[#allocation9 + $0x60] sm:$0xff] %v1167_v29  ;;  %v1170_v31 = vmul.f32 0.17677669, %v1587_v30 }
 0x215   :  { %v1079_v32 = vpop.f32.mrf.mxu1 }
 0x216   :  { %1202 = vst [vmem:[#allocation9 + $0x78] sm:$0xff] %v1170_v31  ;;  %v1168_v33 = vmul.f32 0.17677669, %v1079_v32 }
 0x218   :  { %1200 = vst [vmem:[#allocation9 + $0x68] sm:$0xff] %v1168_v33 }
 0x21f   :  { %v1590_v34 = vpop.f32.mrf.mxu1 }
 0x220   :  { %v1173_v35 = vmul.f32 0.17677669, %v1590_v34 }
 0x221   :  { %v1092_v36 = vpop.f32.mrf.mxu1 }
 0x222   :  { %1205 = vst [vmem:[#allocation9 + $0x90] sm:$0xff] %v1173_v35  ;;  %v1171_v37 = vmul.f32 0.17677669, %v1092_v36 }
 0x223   :  { %v1591_v38 = vpop.f32.mrf.mxu1 }
 0x224   :  { %1203 = vst [vmem:[#allocation9 + $0x80] sm:$0xff] %v1171_v37  ;;  %v1174_v39 = vmul.f32 0.17677669, %v1591_v38 }
 0x225   :  { %v1095_v40 = vpop.f32.mrf.mxu1 }
 0x226   :  { %1206 = vst [vmem:[#allocation9 + $0x98] sm:$0xff] %v1174_v39  ;;  %v1172_v41 = vmul.f32 0.17677669, %v1095_v40 }
 0x228   :  { %1204 = vst [vmem:[#allocation9 + $0x88] sm:$0xff] %v1172_v41 }
 0x22f   :  { %v1594_v42 = vpop.f32.mrf.mxu1 }
 0x230   :  { %v1177_v43 = vmul.f32 0.17677669, %v1594_v42 }
 0x231   :  { %v1108_v44 = vpop.f32.mrf.mxu1 }
 0x232   :  { %1209 = vst [vmem:[#allocation9 + $0xb0] sm:$0xff] %v1177_v43  ;;  %v1175_v45 = vmul.f32 0.17677669, %v1108_v44 }
 0x233   :  { %v1595_v46 = vpop.f32.mrf.mxu1 }
 0x234   :  { %1207 = vst [vmem:[#allocation9 + $0xa0] sm:$0xff] %v1175_v45  ;;  %v1178_v47 = vmul.f32 0.17677669, %v1595_v46 }
 0x235   :  { %v1111_v48 = vpop.f32.mrf.mxu1 }
 0x236   :  { %1210 = vst [vmem:[#allocation9 + $0xb8] sm:$0xff] %v1178_v47  ;;  %v1176_v49 = vmul.f32 0.17677669, %v1111_v48 }
 0x238   :  { %1208 = vst [vmem:[#allocation9 + $0xa8] sm:$0xff] %v1176_v49 }
 0x23f   :  { %v1598_v50 = vpop.f32.mrf.mxu1 }
 0x240   :  { %v1181_v51 = vmul.f32 0.17677669, %v1598_v50 }
 0x241   :  { %v1124_v52 = vpop.f32.mrf.mxu1 }
 0x242   :  { %1213 = vst [vmem:[#allocation9 + $0xd0] sm:$0xff] %v1181_v51  ;;  %v1179_v53 = vmul.f32 0.17677669, %v1124_v52 }
 0x243   :  { %v1599_v54 = vpop.f32.mrf.mxu1 }
 0x244   :  { %1211 = vst [vmem:[#allocation9 + $0xc0] sm:$0xff] %v1179_v53  ;;  %v1182_v56 = vmul.f32 0.17677669, %v1599_v54 }
 0x245   :  { %v1127_v58 = vpop.f32.mrf.mxu1 }
 0x246   :  { %1214 = vst [vmem:[#allocation9 + $0xd8] sm:$0xff] %v1182_v56  ;;  %v1180_v59 = vmul.f32 0.17677669, %v1127_v58 }
 0x248   :  { %1212 = vst [vmem:[#allocation9 + $0xc8] sm:$0xff] %v1180_v59 }
 0x24f   :  { %v1602_v60 = vpop.f32.mrf.mxu1 }
 0x250   :  { %v1185_v61 = vmul.f32 0.17677669, %v1602_v60 }
 0x251   :  { %v1140_v62 = vpop.f32.mrf.mxu1 }
 0x252   :  { %1217 = vst [vmem:[#allocation9 + $0xf0] sm:$0xff] %v1185_v61  ;;  %v1183_v63 = vmul.f32 0.17677669, %v1140_v62 }
 0x253   :  { %v1603_v0 = vpop.f32.mrf.mxu1 }
 0x254   :  { %1215 = vst [vmem:[#allocation9 + $0xe0] sm:$0xff] %v1183_v63  ;;  %v1186_v1 = vmul.f32 0.17677669, %v1603_v0 }
 0x255   :  { %v1143_v2 = vpop.f32.mrf.mxu1 }
 0x256   :  { %1218 = vst [vmem:[#allocation9 + $0xf8] sm:$0xff] %v1186_v1  ;;  %v1184_v3 = vmul.f32 0.17677669, %v1143_v2 }
 0x258   :  { %1216 = vst [vmem:[#allocation9 + $0xe8] sm:$0xff] %v1184_v3 }
 0x259   :  { %1763 = shalt.err (!%p1760_p10)
}
 0x25a   :  { %s1790_s17 = smov 128   ;;  %s1791_s18 = smov 8  }
 0x25b   :  { %1242 = dma.vmem_to_hbm [thread:$0]  %s1237_s15, 4096, %s1972_s5, [#allocation10], %s1790_s17, %s1790_s17, %s1791_s18  }
 0x25c   :  { %1776 = dma.done.wait [#allocation4], 2048  }
 0x25d   :  { %1777 = vsyncadd [#allocation4], 4294965248 }
 0x25e   :  { %1778 = dma.done.wait [#allocation10], 4096  }
 0x25f   :  { %1779 = vsyncadd [#allocation10], 4294963200 }
 0x260   :  { %1249 = vsyncpa [#allocation3], 1 }
 0x261   :  { %1250 = vsyncpa [#allocation6], 1 }
 0x262   :  { %1251 = vsyncpa [#allocation4], 1 }
 0x263   :  { %1252 = vsyncpa [#allocation10], 1 }

</bundles_post_ra>
